<compile_context>
chip_gen: v5e
topology: v5e:2x2
jax: 0.10.0
libtpu: 0.0.40
codegen_flags: <defaults>
</compile_context>

<pallas_src>
import functools

import jax
import jax.numpy as jnp
from jax.experimental import pallas as pl
from jax.experimental.pallas import tpu as pltpu

HIDDEN = 64


# ----------------------------- Pallas kernel --------------------------------
def _critic_kernel(x_ref, w1_ref, b1_ref, w2_ref, b2_ref, w3_ref, b3_ref, o_ref):
    # x_ref: (D, TB) feature-major input tile (batch on the lane axis).
    x = x_ref[...]
    h1 = jnp.tanh(
        jnp.dot(w1_ref[...], x, preferred_element_type=jnp.float32) + b1_ref[...]
    )                                                                # (64, TB)
    h2 = jnp.tanh(
        jnp.dot(w2_ref[...], h1, preferred_element_type=jnp.float32) + b2_ref[...]
    )                                                                # (64, TB)
    v = jnp.tanh(
        jnp.dot(w3_ref[...], h2, preferred_element_type=jnp.float32) + b3_ref[...]
    )                                                                # (1, TB) lane-dense
    o_ref[...] = v.astype(o_ref.dtype)


# ------------------------------ JAX wrapper ---------------------------------
@functools.partial(jax.jit, static_argnames=("block_b", "x_dtype"))
def critic_forward(lidar, params, *, block_b=512, x_dtype=jnp.float32):
    """lidar: (B, lidar_dim) f32  ->  value: (B,) f32

    block_b: batch tile (keep it a multiple of 128; 256/512 fills the MXU on
             v6e/v7x).  Batch is padded up to a multiple of block_b, so any B
             works.
    x_dtype: dtype used to stream the (HBM-bound) input and W1; accumulation
             stays f32 on the MXU.
    """
    w1, b1, w2, b2, w3, b3 = params          # torch layout: W (out,in), b (out,1)
    B, D = lidar.shape

    nb = pl.cdiv(B, block_b)
    Bp = nb * block_b

    # One-time layout pass: feature-major input (batch on the lane axis).
    xT = lidar.T.astype(x_dtype)             # (D, B)
    if Bp != B:
        xT = jnp.pad(xT, ((0, 0), (0, Bp - B)))
    w1c = w1.astype(x_dtype)

    out = pl.pallas_call(
        _critic_kernel,
        out_shape=jax.ShapeDtypeStruct((1, Bp), jnp.float32),
        grid_spec=pltpu.PrefetchScalarGridSpec(
            num_scalar_prefetch=0,
            grid=(nb,),
            in_specs=[
                pl.BlockSpec((D, block_b), lambda i: (0, i)),        # x tile (streams)
                pl.BlockSpec((HIDDEN, D), lambda i: (0, 0)),         # W1 (resident)
                pl.BlockSpec((HIDDEN, 1), lambda i: (0, 0)),         # b1
                pl.BlockSpec((HIDDEN, HIDDEN), lambda i: (0, 0)),    # W2
                pl.BlockSpec((HIDDEN, 1), lambda i: (0, 0)),         # b2
                pl.BlockSpec((1, HIDDEN), lambda i: (0, 0)),         # W3
                pl.BlockSpec((1, 1), lambda i: (0, 0)),              # b3
            ],
            out_specs=pl.BlockSpec((1, block_b), lambda i: (0, i)),  # lane-dense output
        ),
        compiler_params=pltpu.CompilerParams(
            dimension_semantics=("parallel",)
        ),
    )(xT, w1c, b1, w2, b2, w3, b3)

    # (1, Bp) -> (B,)   == torch.squeeze(..., -1) of the (B, 1) result
    return out[0, :B]


# ------------------------ deterministic parameter init ----------------------
def _orthogonal(key, shape, gain):
    """Orthogonal init (gain * Q), matching torch.nn.init.orthogonal_ semantics.
    Returns the weight in torch [out, in] layout."""
    out_f, in_f = shape
    rows, cols = (out_f, in_f) if out_f >= in_f else (in_f, out_f)
    a = jax.random.normal(key, (rows, cols), dtype=jnp.float32)
    q, r = jnp.linalg.qr(a)
    q = q * jnp.sign(jnp.diagonal(r))                                # make init unique
    if out_f < in_f:
        q = q.T
    return gain * q                                                  # (out_f, in_f)


def init_critic_params(key, lidar_dim):
    k1, k2, k3 = jax.random.split(key, 3)
    std = jnp.sqrt(2.0)
    w1 = _orthogonal(k1, (HIDDEN, lidar_dim), std)                   # (64, D)
    b1 = jnp.zeros((HIDDEN, 1), jnp.float32)
    w2 = _orthogonal(k2, (HIDDEN, HIDDEN), std)                      # (64, 64)
    b2 = jnp.zeros((HIDDEN, 1), jnp.float32)
    w3 = _orthogonal(k3, (1, HIDDEN), std)                           # (1, 64)
    b3 = jnp.zeros((1, 1), jnp.float32)
    return (w1, b1, w2, b2, w3, b3)


# -------------------------------- reference ---------------------------------
def critic_reference(lidar, params):
    w1, b1, w2, b2, w3, b3 = params
    h1 = jnp.tanh(lidar @ w1.T + b1.T)
    h2 = jnp.tanh(h1 @ w2.T + b2.T)
    v = jnp.tanh(h2 @ w3.T + b3.T)
    return jnp.squeeze(v, -1)


if __name__ == "__main__":
    key = jax.random.PRNGKey(0)
    k_param, k_x1, k_x2 = jax.random.split(key, 3)

    lidar_dim = 32
    params = init_critic_params(k_param, lidar_dim)

    # --- small run, f32 streaming, non-multiple batch exercises the padding path
    batch = 200
    lidar = jax.random.normal(k_x1, (batch, lidar_dim), dtype=jnp.float32)
    out = critic_forward(lidar, params, block_b=256, x_dtype=jnp.float32)
    out = jax.block_until_ready(out)
    ref = critic_reference(lidar, params)
    assert out.shape == (batch,), out.shape
    assert jnp.allclose(out, ref, atol=1e-4, rtol=1e-4), (
        float(jnp.max(jnp.abs(out - ref)))
    )

    # --- larger run, bf16 input streaming (HBM-bound path), multi-tile grid
    batch2 = 1000
    lidar2 = jax.random.normal(k_x2, (batch2, lidar_dim), dtype=jnp.float32)
    out2 = critic_forward(lidar2, params, block_b=256, x_dtype=jnp.bfloat16)
    out2 = jax.block_until_ready(out2)
    ref2 = critic_reference(lidar2, params)
    assert out2.shape == (batch2,), out2.shape
    assert jnp.allclose(out2, ref2, atol=3e-2, rtol=3e-2), (
        float(jnp.max(jnp.abs(out2 - ref2)))
    )

    print("KERNEL_OK")
</pallas_src>

<mosaic_0001>
module attributes {stable_mosaic.version = 11 : i64} {
  func.func @_critic_kernel(%arg0: i32, %arg1: memref<32x256xf32, #tpu.memory_space<vmem>>, %arg2: memref<64x32xf32, #tpu.memory_space<vmem>>, %arg3: memref<64x1xf32, #tpu.memory_space<vmem>>, %arg4: memref<64x64xf32, #tpu.memory_space<vmem>>, %arg5: memref<64x1xf32, #tpu.memory_space<vmem>>, %arg6: memref<1x64xf32, #tpu.memory_space<vmem>>, %arg7: memref<1x1xf32, #tpu.memory_space<vmem>>, %arg8: memref<1x256xf32, #tpu.memory_space<vmem>>) attributes {dimension_semantics = [#tpu.dimension_semantics<parallel>], iteration_bounds = array<i64: 1>, scalar_prefetch = 0 : i64, scratch_operands = 0 : i64, tpu.core_type = #tpu.core_type<tc>, window_params = [{transform_indices = @transform_0, window_bounds = array<i64: 32, 256>}, {pipeline_mode = #tpu.pipeline_mode<synchronous>, transform_indices = @transform_1, window_bounds = array<i64: 64, 32>}, {pipeline_mode = #tpu.pipeline_mode<synchronous>, transform_indices = @transform_2, window_bounds = array<i64: 64, 1>}, {pipeline_mode = #tpu.pipeline_mode<synchronous>, transform_indices = @transform_3, window_bounds = array<i64: 64, 64>}, {pipeline_mode = #tpu.pipeline_mode<synchronous>, transform_indices = @transform_4, window_bounds = array<i64: 64, 1>}, {pipeline_mode = #tpu.pipeline_mode<synchronous>, transform_indices = @transform_5, window_bounds = array<i64: 1, 64>}, {pipeline_mode = #tpu.pipeline_mode<synchronous>, transform_indices = @transform_6, window_bounds = array<i64: 1, 1>}, {transform_indices = @transform_7, window_bounds = array<i64: 1, 256>}]} {
    %c0 = arith.constant 0 : index
    %c0_0 = arith.constant 0 : index
    %0 = vector.load %arg1[%c0, %c0_0] : memref<32x256xf32, #tpu.memory_space<vmem>>, vector<32x256xf32>
    %c0_1 = arith.constant 0 : index
    %c0_2 = arith.constant 0 : index
    %1 = vector.load %arg2[%c0_1, %c0_2] : memref<64x32xf32, #tpu.memory_space<vmem>>, vector<64x32xf32>
    %cst = arith.constant dense<0.000000e+00> : vector<64x256xf32>
    %2 = tpu.matmul %1, %0, %cst {dimension_numbers = #tpu.dot_dimension_numbers<[1], [0], [0], [1], [0, 0, 1, 1], [], []>} : vector<64x32xf32>, vector<32x256xf32>, vector<64x256xf32> -> vector<64x256xf32>
    %c0_3 = arith.constant 0 : index
    %c0_4 = arith.constant 0 : index
    %3 = vector.load %arg3[%c0_3, %c0_4] : memref<64x1xf32, #tpu.memory_space<vmem>>, vector<64x1xf32>
    %4 = vector.broadcast %3 : vector<64x1xf32> to vector<64x256xf32>
    %5 = arith.addf %2, %4 : vector<64x256xf32>
    %6 = math.tanh %5 : vector<64x256xf32>
    %c0_5 = arith.constant 0 : index
    %c0_6 = arith.constant 0 : index
    %7 = vector.load %arg4[%c0_5, %c0_6] : memref<64x64xf32, #tpu.memory_space<vmem>>, vector<64x64xf32>
    %cst_7 = arith.constant dense<0.000000e+00> : vector<64x256xf32>
    %8 = tpu.matmul %7, %6, %cst_7 {dimension_numbers = #tpu.dot_dimension_numbers<[1], [0], [0], [1], [0, 0, 1, 1], [], []>} : vector<64x64xf32>, vector<64x256xf32>, vector<64x256xf32> -> vector<64x256xf32>
    %c0_8 = arith.constant 0 : index
    %c0_9 = arith.constant 0 : index
    %9 = vector.load %arg5[%c0_8, %c0_9] : memref<64x1xf32, #tpu.memory_space<vmem>>, vector<64x1xf32>
    %10 = vector.broadcast %9 : vector<64x1xf32> to vector<64x256xf32>
    %11 = arith.addf %8, %10 : vector<64x256xf32>
    %12 = math.tanh %11 : vector<64x256xf32>
    %c0_10 = arith.constant 0 : index
    %c0_11 = arith.constant 0 : index
    %13 = vector.load %arg6[%c0_10, %c0_11] : memref<1x64xf32, #tpu.memory_space<vmem>>, vector<1x64xf32>
    %cst_12 = arith.constant dense<0.000000e+00> : vector<1x256xf32>
    %14 = tpu.matmul %13, %12, %cst_12 {dimension_numbers = #tpu.dot_dimension_numbers<[1], [0], [0], [1], [0, 0, 1, 1], [], []>} : vector<1x64xf32>, vector<64x256xf32>, vector<1x256xf32> -> vector<1x256xf32>
    %c0_13 = arith.constant 0 : index
    %c0_14 = arith.constant 0 : index
    %15 = vector.load %arg7[%c0_13, %c0_14] : memref<1x1xf32, #tpu.memory_space<vmem>>, vector<1x1xf32>
    %16 = vector.broadcast %15 : vector<1x1xf32> to vector<1x256xf32>
    %17 = arith.addf %14, %16 : vector<1x256xf32>
    %18 = math.tanh %17 : vector<1x256xf32>
    %c0_15 = arith.constant 0 : index
    %c0_16 = arith.constant 0 : index
    %19 = vector.load %arg8[%c0_15, %c0_16] : memref<1x256xf32, #tpu.memory_space<vmem>>, vector<1x256xf32>
    tpu.vector_store %arg8[%c0_15, %c0_16], %18 {strides = array<i32>} : memref<1x256xf32, #tpu.memory_space<vmem>>, vector<1x256xf32>,
    return
  }
  func.func @transform_0(%arg0: i32) -> (i32, i32) {
    %c0_i32 = arith.constant 0 : i32
    %c0_i32_0 = arith.constant 0 : i32
    return %c0_i32, %arg0 : i32, i32
  }
  func.func @transform_1(%arg0: i32) -> (i32, i32) {
    %c0_i32 = arith.constant 0 : i32
    %c0_i32_0 = arith.constant 0 : i32
    %c0_i32_1 = arith.constant 0 : i32
    return %c0_i32, %c0_i32_0 : i32, i32
  }
  func.func @transform_2(%arg0: i32) -> (i32, i32) {
    %c0_i32 = arith.constant 0 : i32
    %c0_i32_0 = arith.constant 0 : i32
    %c0_i32_1 = arith.constant 0 : i32
    return %c0_i32, %c0_i32_0 : i32, i32
  }
  func.func @transform_3(%arg0: i32) -> (i32, i32) {
    %c0_i32 = arith.constant 0 : i32
    %c0_i32_0 = arith.constant 0 : i32
    %c0_i32_1 = arith.constant 0 : i32
    return %c0_i32, %c0_i32_0 : i32, i32
  }
  func.func @transform_4(%arg0: i32) -> (i32, i32) {
    %c0_i32 = arith.constant 0 : i32
    %c0_i32_0 = arith.constant 0 : i32
    %c0_i32_1 = arith.constant 0 : i32
    return %c0_i32, %c0_i32_0 : i32, i32
  }
  func.func @transform_5(%arg0: i32) -> (i32, i32) {
    %c0_i32 = arith.constant 0 : i32
    %c0_i32_0 = arith.constant 0 : i32
    %c0_i32_1 = arith.constant 0 : i32
    return %c0_i32, %c0_i32_0 : i32, i32
  }
  func.func @transform_6(%arg0: i32) -> (i32, i32) {
    %c0_i32 = arith.constant 0 : i32
    %c0_i32_0 = arith.constant 0 : i32
    %c0_i32_1 = arith.constant 0 : i32
    return %c0_i32, %c0_i32_0 : i32, i32
  }
  func.func @transform_7(%arg0: i32) -> (i32, i32) {
    %c0_i32 = arith.constant 0 : i32
    %c0_i32_0 = arith.constant 0 : i32
    return %c0_i32, %arg0 : i32, i32
  }
}

</mosaic_0001>

<bundles_post_ra>
// kernel: critic_forward.1
= control target key start
LH: loop header
LB: loop body
LE: loop exit
PB: predicated region body
PF: predicated region fallthrough
CT: control target
= control target key end

     0   :  { %s813_s0 = inlined_call_operand.vmem [shape: f32[32,256], index: 0, kind: input, shape index: {}]   ;;  %s814_s1 = inlined_call_operand.vmem [shape: f32[64,32], index: 1, kind: input, shape index: {}]   ;;  %s815_s2 = inlined_call_operand.vmem [shape: f32[64,1], index: 2, kind: input, shape index: {}]   ;;  %s816_s3 = inlined_call_operand.vmem [shape: f32[64,64], index: 3, kind: input, shape index: {}]   ;;  %s817_s4 = inlined_call_operand.vmem [shape: f32[64,1], index: 4, kind: input, shape index: {}]   ;;  %s818_s5 = inlined_call_operand.vmem [shape: f32[1,64], index: 5, kind: input, shape index: {}]   ;;  %s819_s6 = inlined_call_operand.<no memory space> [shape: f32[1,1], index: 6, kind: input, shape index: {}]   ;;  %s820_s7 = inlined_call_operand.hbm [shape: f32[1,256], index: 7, kind: output, shape index: {}]  }
   0x1   :  { %v12_v0 = vstv %s819_s6 }
   0x2   :  { %13 = vst [vmem:[#allocation2] sm:$0x1] %v12_v0 }
   0x3   :  { %v35_v1 = vld [vmem:[%s813_s0 + $0x30] sm:$0xff]  ;;  %v36_v2 = vld [vmem:[%s813_s0 + $0x38] sm:$0xff]  ;;  %v50_v3 = vld [vmem:[%s815_s2 + $0x28] sm:$0xff]  ;;  %v608_v6 = vmov 0   ;;  %vm93_vm0 = vcmask 261120  }
   0x4   :  { %130 = vmatpush.msra.mxu0 %v35_v1  ;;  %171 = vmatpush.msra.mxu1 %v36_v2  ;;  %v33_v4 = vld [vmem:[%s813_s0 + $0x20] sm:$0xff]  ;;  %v34_v5 = vld [vmem:[%s813_s0 + $0x28] sm:$0xff]  ;;  %v31_v7 = vld [vmem:[%s813_s0 + $0x10] sm:$0xff] }
   0x5   :  { %512 = vset.pattern.permute.xlu1 %v608_v6  ;;  %511 = vset.pattern.permute.xlu0 %v608_v6  ;;  %v32_v8 = vld [vmem:[%s813_s0 + $0x18] sm:$0xff]  ;;  %v29_v10 = vld [vmem:[%s813_s0] sm:$0xff]  ;;  %v30_v11 = vld [vmem:[%s813_s0 + $0x8] sm:$0xff] }
   0x6   :  { %80 = vperm.xlu1 %512, %v50_v3   ;;  %131 = vmatpush.msra.mxu0 %v33_v4  ;;  %v52_v9 = vld [vmem:[%s815_s2 + $0x38] sm:$0xff]  ;;  %v37_v12 = vld [vmem:[%s814_s1] sm:$0xff] }
   0x7   :  { %172 = vmatpush.msra.mxu1 %v34_v5  ;;  %90 = vperm.xlu0 %511, %v52_v9  }
   0x8   :  { %132 = vmatpush.msra.mxu0 %v31_v7  ;;  %513 = vset.pattern.permute.xlu2 %v608_v6 }
   0x9   :  { %173 = vmatpush.msra.mxu1 %v32_v8 }
   0xa   :  { %14 = vsyncpa [#allocation4], 0  ;;  %133 = vmatpush.msra.mxu0 %v29_v10  ;;  %v49_v13 = vld [vmem:[%s815_s2 + $0x20] sm:$0xff]  ;;  %v51_v14 = vld [vmem:[%s815_s2 + $0x30] sm:$0xff]  ;;  %vm272_vm1 = vcmask 523264   ;;  %s609_s28 = smov [#allocation3]  }
   0xb   :  { %174 = vmatpush.msra.mxu1 %v30_v11  ;;  %475 = vmatmul.msk.f32.vlgmr.msra.gmra.mxu0 %vm93_vm0, %v37_v12  ;;  %v38_v15 = vld [vmem:[%s814_s1 + $0x8] sm:$0xff]  ;;  %v45_v16 = vld [vmem:[%s815_s2] sm:$0xff]  ;;  %v48_v18 = vld [vmem:[%s815_s2 + $0x18] sm:$0xff]  ;;  %s466_s8 = sshll.u32 %s820_s7, 4  ;;  %vm451_vm2 = vcmask 1040384   ;;  %s467_s8 = int_to_ptr.hbm [resolvable:$true] %s466_s8 }
   0xc   :  { %483 = vmatmul.msk.f32.vlgmr.msra.gmra.mxu1 %vm93_vm0, %v37_v12  ;;  %v46_v17 = vld [vmem:[%s815_s2 + $0x8] sm:$0xff]  ;;  %70 = vperm.xlu2 %513, %v48_v18   ;;  %v39_v19 = vld [vmem:[%s814_s1 + $0x10] sm:$0xff]  ;;  %v40_v23 = vld [vmem:[%s814_s1 + $0x18] sm:$0xff] }
   0xd   :  { %v230_v20 = vld [vmem:[%s817_s4 + $0x30] sm:$0xff]  ;;  %v229_v21 = vld [vmem:[%s817_s4 + $0x28] sm:$0xff]  ;;  %v227_v24 = vld [vmem:[%s817_s4 + $0x18] sm:$0xff] }
   0xe   :  { %75 = vperm.xlu1 %512, %v49_v13   ;;  %v47_v22 = vld [vmem:[%s815_s2 + $0x10] sm:$0xff]  ;;  %v231_v26 = vld [vmem:[%s817_s4 + $0x38] sm:$0xff]  ;;  %v41_v27 = vld [vmem:[%s814_s1 + $0x20] sm:$0xff] }
   0xf   :  { %85 = vperm.xlu0 %511, %v51_v14   ;;  %v226_v25 = vld [vmem:[%s817_s4 + $0x10] sm:$0xff]  ;;  %v396_v28 = vld [vmem:[#allocation2] sm:$0x1]  ;;  %v42_v31 = vld [vmem:[%s814_s1 + $0x28] sm:$0xff] }
  0x10   :  { %v228_v29 = vld [vmem:[%s817_s4 + $0x20] sm:$0xff]  ;;  %v225_v32 = vld [vmem:[%s817_s4 + $0x8] sm:$0xff]  ;;  %v43_v33 = vld [vmem:[%s814_s1 + $0x30] sm:$0xff] }
  0x11   :  { %v224_v30 = vld [vmem:[%s817_s4] sm:$0xff]  ;;  %v44_v34 = vld [vmem:[%s814_s1 + $0x38] sm:$0xff] }
  0x13   :  { %476 = vmatmul.msk.f32.gmra.mxu0 %vm93_vm0, %v38_v15 }
  0x14   :  { %484 = vmatmul.msk.f32.gmra.mxu1 %vm93_vm0, %v38_v15  ;;  %65 = vperm.xlu2 %513, %v47_v22  }
  0x16   :  { %55 = vperm.xlu1 %512, %v45_v16  }
  0x17   :  { %60 = vperm.xlu0 %511, %v46_v17  }
  0x1b   :  { %477 = vmatmul.msk.f32.gmra.mxu0 %vm93_vm0, %v39_v19 }
  0x1c   :  { %485 = vmatmul.msk.f32.gmra.mxu1 %vm93_vm0, %v39_v19  ;;  %269 = vperm.xlu2 %513, %v231_v26  }
  0x1e   :  { %259 = vperm.xlu1 %512, %v229_v21  }
  0x1f   :  { %264 = vperm.xlu0 %511, %v230_v20  }
  0x23   :  { %478 = vmatmul.msk.f32.gmra.mxu0 %vm93_vm0, %v40_v23 }
  0x24   :  { %486 = vmatmul.msk.f32.gmra.mxu1 %vm93_vm0, %v40_v23  ;;  %254 = vperm.xlu2 %513, %v228_v29   ;;  %v218_v29 = vld [vmem:[%s816_s3 + $0x10] sm:$0xff] }
  0x26   :  { %244 = vperm.xlu1 %512, %v226_v25   ;;  %v216_v25 = vld [vmem:[%s816_s3] sm:$0xff] }
  0x27   :  { %249 = vperm.xlu0 %511, %v227_v24  }
  0x2b   :  { %479 = vmatmul.msk.f32.gmra.mxu0 %vm93_vm0, %v41_v27 }
  0x2c   :  { %487 = vmatmul.msk.f32.gmra.mxu1 %vm93_vm0, %v41_v27  ;;  %239 = vperm.xlu2 %513, %v225_v32   ;;  %v221_v32 = vld [vmem:[%s816_s3 + $0x28] sm:$0xff] }
  0x2e   :  { %399 = vperm.xlu1 %512, %v396_v28   ;;  %v217_v28 = vld [vmem:[%s816_s3 + $0x8] sm:$0xff] }
  0x2f   :  { %234 = vperm.xlu0 %511, %v224_v30   ;;  %v219_v30 = vld [vmem:[%s816_s3 + $0x18] sm:$0xff] }
  0x33   :  { %480 = vmatmul.msk.f32.gmra.mxu0 %vm93_vm0, %v42_v31 }
  0x34   :  { %488 = vmatmul.msk.f32.gmra.mxu1 %vm93_vm0, %v42_v31  ;;  %v220_v31 = vld [vmem:[%s816_s3 + $0x20] sm:$0xff] }
  0x3b   :  { %481 = vmatmul.msk.f32.gmra.mxu0 %vm93_vm0, %v43_v33 }
  0x3c   :  { %489 = vmatmul.msk.f32.gmra.mxu1 %vm93_vm0, %v43_v33  ;;  %v222_v33 = vld [vmem:[%s816_s3 + $0x30] sm:$0xff] }
  0x43   :  { %482 = vmatmul.msk.f32.gmra.mxu0 %vm93_vm0, %v44_v34 }
  0x44   :  { %490 = vmatmul.msk.f32.gmra.mxu1 %vm93_vm0, %v44_v34  ;;  %v223_v34 = vld [vmem:[%s816_s3 + $0x38] sm:$0xff] }
  0x66   :  { %v71_v51 = vpop.permute.xlu2 %70 }
  0x6e   :  { %v66_v0 = vpop.permute.xlu2 %65 }
  0x78   :  { %v81_v48 = vpop.permute.xlu1 %80 }
  0x79   :  { %v91_v47 = vpop.permute.xlu0 %90 }
  0x80   :  { %v76_v54 = vpop.permute.xlu1 %75 }
  0x81   :  { %v86_v52 = vpop.permute.xlu0 %85 }
  0x88   :  { %v135_v35 = vpop.f32.mrf.mxu0  ;;  %v56_v9 = vpop.permute.xlu1 %55 }
  0x89   :  { %v176_v36 = vpop.f32.mrf.mxu1  ;;  %v61_v4 = vpop.permute.xlu0 %60  ;;  %v136_v14 = vadd.f32 %v135_v35, %v56_v9 }
  0x8a   :  { %v177_v16 = vadd.f32 %v176_v36, %v56_v9 }
  0x90   :  { %v138_v37 = vpop.f32.mrf.mxu0 }
  0x91   :  { %v179_v38 = vpop.f32.mrf.mxu1  ;;  %v139_v10 = vadd.f32 %v138_v37, %v61_v4 }
  0x92   :  { %v180_v12 = vadd.f32 %v179_v38, %v61_v4 }
  0x98   :  { %v141_v39 = vpop.f32.mrf.mxu0 }
  0x99   :  { %v182_v40 = vpop.f32.mrf.mxu1  ;;  %v142_v5 = vadd.f32 %v141_v39, %v66_v0 }
  0x9a   :  { %v183_v7 = vadd.f32 %v182_v40, %v66_v0 }
  0xa0   :  { %v144_v41 = vpop.f32.mrf.mxu0 }
  0xa1   :  { %v185_v42 = vpop.f32.mrf.mxu1  ;;  %v145_v1 = vadd.f32 %v144_v41, %v71_v51 }
  0xa2   :  { %v186_v2 = vadd.f32 %v185_v42, %v71_v51  ;;  %v260_v51 = vpop.permute.xlu1 %259 }
  0xa8   :  { %v147_v43 = vpop.f32.mrf.mxu0 }
  0xa9   :  { %v188_v44 = vpop.f32.mrf.mxu1  ;;  %v148_v62 = vadd.f32 %v147_v43, %v76_v54 }
  0xaa   :  { %v189_v63 = vadd.f32 %v188_v44, %v76_v54 }
  0xb0   :  { %v150_v45 = vpop.f32.mrf.mxu0 }
  0xb1   :  { %v191_v46 = vpop.f32.mrf.mxu1  ;;  %v151_v60 = vadd.f32 %v150_v45, %v81_v48 }
  0xb2   :  { %v192_v61 = vadd.f32 %v191_v46, %v81_v48  ;;  %v265_v48 = vpop.permute.xlu0 %264 }
  0xb8   :  { %v153_v49 = vpop.f32.mrf.mxu0 }
  0xb9   :  { %v194_v50 = vpop.f32.mrf.mxu1  ;;  %v154_v55 = vadd.f32 %v153_v49, %v86_v52 }
  0xba   :  { %v195_v58 = vadd.f32 %v194_v50, %v86_v52 }
  0xc0   :  { %v156_v53 = vpop.f32.mrf.mxu0 }
  0xc1   :  { %v157_v56 = vadd.f32 %v156_v53, %v91_v47  ;;  %v197_v57 = vpop.f32.mrf.mxu1 }
  0xc2   :  { %v198_v59 = vadd.f32 %v197_v57, %v91_v47  ;;  %v270_v47 = vpop.permute.xlu2 %269  ;;  %v250_v57 = vpop.permute.xlu0 %249 }
  0xc3   :  { %514 = vtanh.f32 %v157_v56 }
  0xc4   :  { %516 = vtanh.f32 %v198_v59 }
  0xc5   :  { %518 = vtanh.f32 %v154_v55 }
  0xc6   :  { %520 = vtanh.f32 %v195_v58 }
  0xc7   :  { %522 = vtanh.f32 %v151_v60 }
  0xc8   :  { %524 = vtanh.f32 %v192_v61 }
  0xc9   :  { %v515_v3 = vpop.eup %514  ;;  %526 = vtanh.f32 %v148_v62 }
  0xca   :  { %v517_v6 = vpop.eup %516  ;;  %528 = vtanh.f32 %v189_v63  ;;  %305 = vmatpush.msra.mxu2 %v515_v3  ;;  %v255_v52 = vpop.permute.xlu2 %254 }
  0xcb   :  { %v519_v8 = vpop.eup %518  ;;  %530 = vtanh.f32 %v145_v1  ;;  %346 = vmatpush.msra.mxu3 %v517_v6  ;;  %v245_v1 = vpop.permute.xlu1 %244 }
  0xcc   :  { %v521_v11 = vpop.eup %520  ;;  %532 = vtanh.f32 %v186_v2  ;;  %306 = vmatpush.msra.mxu2 %v519_v8 }
  0xcd   :  { %v523_v13 = vpop.eup %522  ;;  %534 = vtanh.f32 %v142_v5  ;;  %347 = vmatpush.msra.mxu3 %v521_v11  ;;  %v235_v11 = vpop.permute.xlu0 %234 }
  0xce   :  { %v525_v15 = vpop.eup %524  ;;  %536 = vtanh.f32 %v183_v7  ;;  %307 = vmatpush.msra.mxu2 %v523_v13 }
  0xcf   :  { %v527_v17 = vpop.eup %526  ;;  %538 = vtanh.f32 %v139_v10  ;;  %348 = vmatpush.msra.mxu3 %v525_v15 }
  0xd0   :  { %v529_v18 = vpop.eup %528  ;;  %540 = vtanh.f32 %v180_v12  ;;  %308 = vmatpush.msra.mxu2 %v527_v17 }
  0xd1   :  { %v531_v19 = vpop.eup %530  ;;  %542 = vtanh.f32 %v136_v14  ;;  %349 = vmatpush.msra.mxu3 %v529_v18 }
  0xd2   :  { %v533_v20 = vpop.eup %532  ;;  %544 = vtanh.f32 %v177_v16  ;;  %309 = vmatpush.msra.mxu2 %v531_v19  ;;  %v240_v6 = vpop.permute.xlu2 %239 }
  0xd3   :  { %v535_v21 = vpop.eup %534  ;;  %350 = vmatpush.msra.mxu3 %v533_v20 }
  0xd4   :  { %v537_v22 = vpop.eup %536  ;;  %310 = vmatpush.msra.mxu2 %v535_v21 }
  0xd5   :  { %v539_v23 = vpop.eup %538  ;;  %351 = vmatpush.msra.mxu3 %v537_v22 }
  0xd6   :  { %v541_v24 = vpop.eup %540  ;;  %311 = vmatpush.msra.mxu2 %v539_v23 }
  0xd7   :  { %v543_v26 = vpop.eup %542  ;;  %352 = vmatpush.msra.mxu3 %v541_v24 }
  0xd8   :  { %v545_v27 = vpop.eup %544  ;;  %312 = vmatpush.msra.mxu2 %v543_v26 }
  0xd9   :  { %353 = vmatpush.msra.mxu3 %v545_v27  ;;  %491 = vmatmul.msk.f32.vlgmr.msra.gmra.mxu2 %vm272_vm1, %v216_v25 }
  0xda   :  { %499 = vmatmul.msk.f32.vlgmr.msra.gmra.mxu3 %vm272_vm1, %v216_v25  ;;  %v395_v25 = vld [vmem:[%s818_s5] sm:$0x1]  ;;  %s464_s5 = sshll.u32 %s609_s28, 4  ;;  %s465_s5 = int_to_ptr.vmem [resolvable:$true] %s464_s5 }
  0xe1   :  { %492 = vmatmul.msk.f32.gmra.mxu2 %vm272_vm1, %v217_v28 }
  0xe2   :  { %500 = vmatmul.msk.f32.gmra.mxu3 %vm272_vm1, %v217_v28  ;;  %v400_v28 = vpop.permute.xlu1 %399 }
  0xe9   :  { %493 = vmatmul.msk.f32.gmra.mxu2 %vm272_vm1, %v218_v29 }
  0xea   :  { %501 = vmatmul.msk.f32.gmra.mxu3 %vm272_vm1, %v218_v29  ;;  %v402_v29 = vperm.slane %v400_v28, 0 }
  0xf1   :  { %494 = vmatmul.msk.f32.gmra.mxu2 %vm272_vm1, %v219_v30 }
  0xf2   :  { %502 = vmatmul.msk.f32.gmra.mxu3 %vm272_vm1, %v219_v30 }
  0xf9   :  { %495 = vmatmul.msk.f32.gmra.mxu2 %vm272_vm1, %v220_v31 }
  0xfa   :  { %503 = vmatmul.msk.f32.gmra.mxu3 %vm272_vm1, %v220_v31 }
 0x101   :  { %496 = vmatmul.msk.f32.gmra.mxu2 %vm272_vm1, %v221_v32 }
 0x102   :  { %504 = vmatmul.msk.f32.gmra.mxu3 %vm272_vm1, %v221_v32 }
 0x109   :  { %497 = vmatmul.msk.f32.gmra.mxu2 %vm272_vm1, %v222_v33 }
 0x10a   :  { %505 = vmatmul.msk.f32.gmra.mxu3 %vm272_vm1, %v222_v33 }
 0x111   :  { %498 = vmatmul.msk.f32.gmra.mxu2 %vm272_vm1, %v223_v34 }
 0x112   :  { %506 = vmatmul.msk.f32.gmra.mxu3 %vm272_vm1, %v223_v34  ;;  %v454_v34 = vlaneseq }
 0x114   :  { %vm456_vm3 = vcmp.lt.s32.totalorder %v454_v34, 256 }
 0x15c   :  { %v314_v35 = vpop.f32.mrf.mxu2 }
 0x15d   :  { %v355_v36 = vpop.f32.mrf.mxu3  ;;  %v315_v14 = vadd.f32 %v314_v35, %v235_v11 }
 0x15e   :  { %v356_v16 = vadd.f32 %v355_v36, %v235_v11 }
 0x164   :  { %v317_v37 = vpop.f32.mrf.mxu2 }
 0x165   :  { %v358_v38 = vpop.f32.mrf.mxu3  ;;  %v318_v9 = vadd.f32 %v317_v37, %v240_v6 }
 0x166   :  { %v359_v12 = vadd.f32 %v358_v38, %v240_v6 }
 0x16c   :  { %v320_v39 = vpop.f32.mrf.mxu2 }
 0x16d   :  { %v361_v40 = vpop.f32.mrf.mxu3  ;;  %v321_v4 = vadd.f32 %v320_v39, %v245_v1 }
 0x16e   :  { %v362_v7 = vadd.f32 %v361_v40, %v245_v1 }
 0x174   :  { %v323_v41 = vpop.f32.mrf.mxu2 }
 0x175   :  { %v364_v42 = vpop.f32.mrf.mxu3  ;;  %v324_v0 = vadd.f32 %v323_v41, %v250_v57 }
 0x176   :  { %v365_v2 = vadd.f32 %v364_v42, %v250_v57 }
 0x17c   :  { %v326_v43 = vpop.f32.mrf.mxu2 }
 0x17d   :  { %v367_v44 = vpop.f32.mrf.mxu3  ;;  %v327_v62 = vadd.f32 %v326_v43, %v255_v52 }
 0x17e   :  { %v368_v63 = vadd.f32 %v367_v44, %v255_v52 }
 0x184   :  { %v329_v45 = vpop.f32.mrf.mxu2 }
 0x185   :  { %v370_v46 = vpop.f32.mrf.mxu3  ;;  %v330_v60 = vadd.f32 %v329_v45, %v260_v51 }
 0x186   :  { %v371_v61 = vadd.f32 %v370_v46, %v260_v51 }
 0x18c   :  { %v332_v49 = vpop.f32.mrf.mxu2 }
 0x18d   :  { %v373_v50 = vpop.f32.mrf.mxu3  ;;  %v333_v54 = vadd.f32 %v332_v49, %v265_v48 }
 0x18e   :  { %v374_v58 = vadd.f32 %v373_v50, %v265_v48 }
 0x194   :  { %v335_v53 = vpop.f32.mrf.mxu2 }
 0x195   :  { %v336_v55 = vadd.f32 %v335_v53, %v270_v47  ;;  %v376_v56 = vpop.f32.mrf.mxu3 }
 0x196   :  { %v377_v59 = vadd.f32 %v376_v56, %v270_v47 }
 0x197   :  { %546 = vtanh.f32 %v336_v55 }
 0x198   :  { %548 = vtanh.f32 %v377_v59 }
 0x199   :  { %550 = vtanh.f32 %v333_v54 }
 0x19a   :  { %552 = vtanh.f32 %v374_v58 }
 0x19b   :  { %554 = vtanh.f32 %v330_v60 }
 0x19c   :  { %556 = vtanh.f32 %v371_v61 }
 0x19d   :  { %v547_v3 = vpop.eup %546  ;;  %558 = vtanh.f32 %v327_v62 }
 0x19e   :  { %v549_v5 = vpop.eup %548  ;;  %560 = vtanh.f32 %v368_v63  ;;  %414 = vmatpush.msrb.mxu0 %v547_v3 }
 0x19f   :  { %v551_v8 = vpop.eup %550  ;;  %562 = vtanh.f32 %v324_v0  ;;  %434 = vmatpush.msrb.mxu1 %v549_v5 }
 0x1a0   :  { %v553_v10 = vpop.eup %552  ;;  %564 = vtanh.f32 %v365_v2  ;;  %415 = vmatpush.msrb.mxu0 %v551_v8 }
 0x1a1   :  { %v555_v13 = vpop.eup %554  ;;  %566 = vtanh.f32 %v321_v4  ;;  %435 = vmatpush.msrb.mxu1 %v553_v10 }
 0x1a2   :  { %v557_v15 = vpop.eup %556  ;;  %568 = vtanh.f32 %v362_v7  ;;  %416 = vmatpush.msrb.mxu0 %v555_v13 }
 0x1a3   :  { %v559_v17 = vpop.eup %558  ;;  %570 = vtanh.f32 %v318_v9  ;;  %436 = vmatpush.msrb.mxu1 %v557_v15 }
 0x1a4   :  { %v561_v18 = vpop.eup %560  ;;  %572 = vtanh.f32 %v359_v12  ;;  %417 = vmatpush.msrb.mxu0 %v559_v17 }
 0x1a5   :  { %v563_v19 = vpop.eup %562  ;;  %574 = vtanh.f32 %v315_v14  ;;  %437 = vmatpush.msrb.mxu1 %v561_v18 }
 0x1a6   :  { %v565_v20 = vpop.eup %564  ;;  %576 = vtanh.f32 %v356_v16  ;;  %418 = vmatpush.msrb.mxu0 %v563_v19 }
 0x1a7   :  { %v567_v21 = vpop.eup %566  ;;  %438 = vmatpush.msrb.mxu1 %v565_v20 }
 0x1a8   :  { %v569_v22 = vpop.eup %568  ;;  %419 = vmatpush.msrb.mxu0 %v567_v21 }
 0x1a9   :  { %v571_v23 = vpop.eup %570  ;;  %439 = vmatpush.msrb.mxu1 %v569_v22 }
 0x1aa   :  { %v573_v24 = vpop.eup %572  ;;  %420 = vmatpush.msrb.mxu0 %v571_v23 }
 0x1ab   :  { %v575_v26 = vpop.eup %574  ;;  %440 = vmatpush.msrb.mxu1 %v573_v24 }
 0x1ac   :  { %v577_v27 = vpop.eup %576  ;;  %421 = vmatpush.msrb.mxu0 %v575_v26 }
 0x1ad   :  { %441 = vmatpush.msrb.mxu1 %v577_v27  ;;  %507 = vmatmul.msk.f32.vlgmr.msrb.gmra.mxu0 %vm272_vm1, %v395_v25 }
 0x1ae   :  { %508 = vmatmul.msk.f32.vlgmr.msrb.gmra.mxu1 %vm272_vm1, %v395_v25 }
 0x22a   :  { %v423_v30 = vpop.f32.mrf.mxu0 }
 0x22b   :  { %v443_v31 = vpop.f32.mrf.mxu1  ;;  %v424_v32 = vadd.f32 %v423_v30, %v402_v29 }
 0x22c   :  { %v444_v33 = vadd.f32 %v443_v31, %v402_v29 }
 0x22e   :  { %578 = vtanh.f32 %v444_v33 }
 0x22f   :  { %580 = vtanh.f32 %v424_v32 }
 0x234   :  { %v579_v35 = vpop.eup %578 }
 0x235   :  { %v450_v36 = vrot.slane %v579_v35, 7  ;;  %v581_v37 = vpop.eup %580 }
 0x237   :  { %v452_v38 = vsel %vm451_vm2, %v581_v37, %v450_v36 }
 0x238   :  { %458 = vst.msk [vmem:[#allocation3] sm:$0x3] %vm456_vm3, %v452_v38 }
 0x239   :  { %469 = dma.vmem_to_hbm [thread:$0]  %s465_s5, 32, %s467_s8, [#allocation4]  }
 0x23a   :  { %606 = dma.done.wait [#allocation4], 32  }
 0x23b   :  { %607 = vsyncadd [#allocation4], 4294967264 }
 0x23c   :  { %474 = vsyncpa [#allocation4], 1 }

</bundles_post_ra>
